<compile_context>
chip_gen: v7x
topology: tpu7x:2x2x1
jax: 0.10.0
libtpu: 0.0.40
codegen_flags: <defaults>
</compile_context>

<pallas_src>
import jax
import jax.numpy as jnp
from jax.experimental import pallas as pl
from jax.experimental.pallas import tpu as pltpu

# At most this many concurrently outstanding HBM->HBM DMAs.  A handful of
# large chunks is enough to saturate HBM bandwidth; more only adds descriptors.
_MAX_OUTSTANDING_DMAS = 4

# Cap on the lane-dense last-dim width of the flattened view.
_LANE_WIDTH_CAP = 32768


def _lane_dense_view(shape):
    """Pick a 2-D view (rows, cols) with cols the largest multiple-of-128
    divisor of the element count (capped).  Falls back to (1, n) — the DMA
    path issues no vector stores, so any contiguous view is correct."""
    n = 1
    for d in shape:
        n *= d
    best = None
    cap = min(n, _LANE_WIDTH_CAP)
    for cand in range(128, cap + 1, 128):
        if n % cand == 0:
            best = cand
    if best is None:
        return (1, n)
    return (n // best, best)


def _make_hbm_copy_kernel(row_splits):
    """Kernel factory: copy each (start, size) row-chunk HBM->HBM via DMA.

    All DMAs are started before any wait so the chunks overlap on the DMA
    engines; splits are static Python ints (shapes are known at trace time).
    """

    def kernel(x_hbm, o_hbm, sems):
        copies = []
        for k, (r0, rs) in enumerate(row_splits):
            cp = pltpu.make_async_copy(
                x_hbm.at[pl.ds(r0, rs), :],
                o_hbm.at[pl.ds(r0, rs), :],
                sems.at[k],
            )
            cp.start()
            copies.append(cp)
        for cp in copies:
            cp.wait()

    return kernel


def _identity_copy_2d(x2d: jax.Array) -> jax.Array:
    rows, cols = x2d.shape
    n_chunks = max(1, min(_MAX_OUTSTANDING_DMAS, rows))
    base, rem = divmod(rows, n_chunks)
    splits = []
    r0 = 0
    for k in range(n_chunks):
        rs = base + (1 if k < rem else 0)
        if rs == 0:
            continue
        splits.append((r0, rs))
        r0 += rs

    return pl.pallas_call(
        _make_hbm_copy_kernel(tuple(splits)),
        out_shape=jax.ShapeDtypeStruct((rows, cols), x2d.dtype),
        # Both operands stay in HBM; the kernel moves data with explicit DMAs,
        # so there is no VMEM double-buffer footprint and no grid to step.
        in_specs=[pl.BlockSpec(memory_space=pl.ANY)],
        out_specs=pl.BlockSpec(memory_space=pl.ANY),
        scratch_shapes=[pltpu.SemaphoreType.DMA((len(splits),))],
    )(x2d)


@jax.jit
def dynamatte_forward(x: jax.Array) -> jax.Array:
    """Pallas stand-in for Dynamatte.forward() (reference forward is a no-op).

    Identity pass implemented as direct HBM->HBM DMA copies over a lane-dense
    flattened view; the reshapes are metadata-only for a contiguous array.
    """
    view = _lane_dense_view(x.shape)
    out2d = _identity_copy_2d(x.reshape(view))
    return out2d.reshape(x.shape)


if __name__ == "__main__":
    key = jax.random.PRNGKey(0)
    # Small synthetic input consistent with a video-compositing model:
    # batch=2, channels=4 (RGBA-like), spatial 16x16, NCHW convention.
    x = jax.random.normal(key, (2, 4, 16, 16), dtype=jnp.float32)

    y = dynamatte_forward(x)
    y = jax.block_until_ready(y)

    # Sanity check: identity semantics (the only well-defined behavior given
    # the empty reference forward).  x is NOT donated, so it stays readable.
    assert y.shape == (2, 4, 16, 16) and y.dtype == jnp.float32
    assert bool(jnp.allclose(y, x))

    print("KERNEL_OK")
</pallas_src>

<mosaic_0001>
module attributes {stable_mosaic.version = 11 : i64} {
  func.func @kernel(%arg0: memref<1x2048xf32, #tpu.memory_space<any>>, %arg1: memref<1x2048xf32, #tpu.memory_space<any>>, %arg2: memref<1x!tpu.dma_semaphore, #tpu.memory_space<semaphore_mem>>) attributes {dimension_semantics = [], scalar_prefetch = 0 : i64, scratch_operands = 1 : i64, tpu.core_type = #tpu.core_type<tc>} {
    %c0_i32 = arith.constant 0 : i32
    %c0_i32_0 = arith.constant 0 : i32
    %c0_i32_1 = arith.constant 0 : i32
    %0 = tpu.memref_slice %arg0[%c0_i32_0, %c0_i32_1] : memref<1x2048xf32, #tpu.memory_space<any>> -> memref<1x2048xf32, #tpu.memory_space<any>>
    %c0_i32_2 = arith.constant 0 : i32
    %c0_i32_3 = arith.constant 0 : i32
    %1 = tpu.memref_slice %arg1[%c0_i32_2, %c0_i32_3] : memref<1x2048xf32, #tpu.memory_space<any>> -> memref<1x2048xf32, #tpu.memory_space<any>>
    %2 = tpu.memref_slice %arg2[%c0_i32] : memref<1x!tpu.dma_semaphore, #tpu.memory_space<semaphore_mem>> -> memref<1x!tpu.dma_semaphore, #tpu.memory_space<semaphore_mem>>
    %3 = tpu.memref_squeeze %2 : memref<1x!tpu.dma_semaphore, #tpu.memory_space<semaphore_mem>> -> memref<!tpu.dma_semaphore, #tpu.memory_space<semaphore_mem>>
    tpu.enqueue_dma source(%0 : memref<1x2048xf32, #tpu.memory_space<any>>) target(%1 : memref<1x2048xf32, #tpu.memory_space<any>>) target_semaphore(%3 : memref<!tpu.dma_semaphore, #tpu.memory_space<semaphore_mem>>)
    %c0_i32_4 = arith.constant 0 : i32
    %c0_i32_5 = arith.constant 0 : i32
    %c0_i32_6 = arith.constant 0 : i32
    %4 = tpu.memref_slice %arg0[%c0_i32_5, %c0_i32_6] : memref<1x2048xf32, #tpu.memory_space<any>> -> memref<1x2048xf32, #tpu.memory_space<any>>
    %c0_i32_7 = arith.constant 0 : i32
    %c0_i32_8 = arith.constant 0 : i32
    %5 = tpu.memref_slice %arg1[%c0_i32_7, %c0_i32_8] : memref<1x2048xf32, #tpu.memory_space<any>> -> memref<1x2048xf32, #tpu.memory_space<any>>
    %6 = tpu.memref_slice %arg2[%c0_i32_4] : memref<1x!tpu.dma_semaphore, #tpu.memory_space<semaphore_mem>> -> memref<1x!tpu.dma_semaphore, #tpu.memory_space<semaphore_mem>>
    %7 = tpu.memref_squeeze %6 : memref<1x!tpu.dma_semaphore, #tpu.memory_space<semaphore_mem>> -> memref<!tpu.dma_semaphore, #tpu.memory_space<semaphore_mem>>
    tpu.wait_dma2 semaphore(%7 : memref<!tpu.dma_semaphore, #tpu.memory_space<semaphore_mem>>) src(%4 : memref<1x2048xf32, #tpu.memory_space<any>>) dst(%5 : memref<1x2048xf32, #tpu.memory_space<any>>)
    return
  }
}

</mosaic_0001>

<bundles_post_ra>
// kernel: dynamatte_forward.1
= control target key start
LH: loop header
LB: loop body
LE: loop exit
PB: predicated region body
PF: predicated region fallthrough
CT: control target
= control target key end

     0   :  { %s92_s0 = inlined_call_operand.vmem [shape: f32[1,2048], index: 0, kind: input, shape index: {}]   ;;  %s93_s1 = inlined_call_operand.vmem [shape: f32[1,2048], index: 1, kind: output, shape index: {}]  }
   0x1   :  { %v38_v0 = vld [vmem:[%s92_s0] sm:$0xff]  ;;  %v40_v1 = vld [vmem:[%s92_s0 + $0x8] sm:$0xff] }
   0x2   :  { %39 = vst [vmem:[%s93_s1] sm:$0xff] %v38_v0  ;;  %41 = vst [vmem:[%s93_s1 + $0x8] sm:$0xff] %v40_v1 }
   0x3   :  { %49 = vsyncadd [#allocation2], 256 }
   0x4   :  { %68 = dma.done.wait [#allocation2], 256 }
   0x5   :  { %69 = vsyncadd [#allocation2], 4294967040 }
   0x6   :  { %53 = vsyncmov [#allocation2] }
   0x9   :  { %s54_s14 = vpop.sfrf %53 }
   0xa   :  { %p67_p0 = scmp.ne.s32.totalorder %s54_s14, 0 }
   0xc   :  { %58 = shalt.err (%p67_p0)  }

</bundles_post_ra>
